<compile_context>
chip_gen: v6e
topology: v6e:2x2x1
jax: 0.10.0
libtpu: 0.0.40
codegen_flags: <defaults>
</compile_context>

<pallas_src>
import functools
import math

import jax
import jax.numpy as jnp
from jax.experimental import pallas as pl
from jax.experimental.pallas import tpu as pltpu


# ------------------------------------------------------------------ kernel --

def _sacluster_kernel(x_ref, g_ref, b_ref, win_ref, bin_ref,
                      wout_ref, bout_ref, o_ref, *, num_heads, eps):
    """Fused LayerNorm + multi-head self-attention + out-proj + residual.

    x_ref   : (1, N, P)   input block (one batch element)
    g_ref   : (1, P)      LayerNorm gamma
    b_ref   : (1, P)      LayerNorm beta
    win_ref : (P, 3P)     packed in-projection weight, (in, out) layout
    bin_ref : (1, 3P)     packed in-projection bias
    wout_ref: (P, P)      out-projection weight, (in, out) layout
    bout_ref: (1, P)      out-projection bias
    o_ref   : (1, N, P)   output block
    """
    x = x_ref[0]                                    # (N, P) f32
    n_tok, d_model = x.shape
    dh = d_model // num_heads
    scale = 1.0 / math.sqrt(dh)

    # --- LayerNorm (biased variance, torch semantics) ---
    mu = jnp.mean(x, axis=-1, keepdims=True)
    xc = x - mu
    var = jnp.mean(xc * xc, axis=-1, keepdims=True)
    xn = xc * jax.lax.rsqrt(var + eps) * g_ref[...] + b_ref[...]

    # --- packed QKV in-projection: one MXU matmul ---
    qkv = jnp.dot(xn, win_ref[...],
                  preferred_element_type=jnp.float32) + bin_ref[...]   # (N, 3P)

    wout = wout_ref[...]                            # (P, P)

    # --- per-head attention; fold each head straight into the out-proj ---
    acc = jnp.zeros((n_tok, d_model), jnp.float32)
    for h in range(num_heads):                      # static unroll, H is small
        qh = qkv[:, h * dh:(h + 1) * dh] * scale
        kh = qkv[:, d_model + h * dh: d_model + (h + 1) * dh]
        vh = qkv[:, 2 * d_model + h * dh: 2 * d_model + (h + 1) * dh]

        s = jnp.dot(qh, kh.T, preferred_element_type=jnp.float32)      # (N, N)
        s = s - jnp.max(s, axis=-1, keepdims=True)
        e = jnp.exp(s)
        prob = e / jnp.sum(e, axis=-1, keepdims=True)

        oh = jnp.dot(prob, vh, preferred_element_type=jnp.float32)     # (N, Dh)
        acc = acc + jnp.dot(oh, wout[h * dh:(h + 1) * dh, :],
                            preferred_element_type=jnp.float32)

    # --- out-proj bias + residual (dropout = identity in eval mode) ---
    out = acc + bout_ref[...] + x
    o_ref[0] = out.astype(o_ref.dtype)


# ----------------------------------------------------------------- wrapper --

def preprocess_params(raw):
    """One-time parameter prep: pre-transpose weights to (in, out) layout and
    reshape biases / LN affine params to 2-D rows so the forward pass contains
    no transpose / reshape / cast glue ops."""
    P = raw['out_proj_weight'].shape[0]
    return {
        'ln_g': raw['ln_g'].reshape(1, P).astype(jnp.float32),
        'ln_b': raw['ln_b'].reshape(1, P).astype(jnp.float32),
        'w_in_t': raw['in_proj_weight'].T.astype(jnp.float32),     # (P, 3P)
        'b_in': raw['in_proj_bias'].reshape(1, 3 * P).astype(jnp.float32),
        'w_out_t': raw['out_proj_weight'].T.astype(jnp.float32),   # (P, P)
        'b_out': raw['out_proj_bias'].reshape(1, P).astype(jnp.float32),
    }


def sacluster_forward(P_feature, params, *, num_heads, eps=1e-5):
    """P_feature: (B, N, P) float32 (batch_first=True, matching PyTorch)."""
    B, N, P = P_feature.shape
    kernel = functools.partial(_sacluster_kernel, num_heads=num_heads, eps=eps)
    return pl.pallas_call(
        kernel,
        out_shape=jax.ShapeDtypeStruct((B, N, P), P_feature.dtype),
        grid=(B,),
        in_specs=[
            pl.BlockSpec((1, N, P), lambda b: (b, 0, 0)),     # x
            pl.BlockSpec((1, P), lambda b: (0, 0)),           # ln gamma
            pl.BlockSpec((1, P), lambda b: (0, 0)),           # ln beta
            pl.BlockSpec((P, 3 * P), lambda b: (0, 0)),       # in-proj W^T
            pl.BlockSpec((1, 3 * P), lambda b: (0, 0)),       # in-proj bias
            pl.BlockSpec((P, P), lambda b: (0, 0)),           # out-proj W^T
            pl.BlockSpec((1, P), lambda b: (0, 0)),           # out-proj bias
        ],
        out_specs=pl.BlockSpec((1, N, P), lambda b: (b, 0, 0)),
        compiler_params=pltpu.CompilerParams(
            dimension_semantics=("parallel",)),               # batch -> 2nd TC on v7x
    )(P_feature, params['ln_g'], params['ln_b'],
      params['w_in_t'], params['b_in'],
      params['w_out_t'], params['b_out'])


# --------------------------------------------------------- pure-JAX reference

def reference_sacluster(x, params, num_heads, eps=1e-5):
    B, N, P = x.shape
    dh = P // num_heads
    mu = x.mean(-1, keepdims=True)
    var = ((x - mu) ** 2).mean(-1, keepdims=True)
    xn = (x - mu) * jax.lax.rsqrt(var + eps) * params['ln_g'][0] + params['ln_b'][0]
    qkv = xn @ params['w_in_t'] + params['b_in'][0]
    q, k, v = qkv[..., :P], qkv[..., P:2 * P], qkv[..., 2 * P:]
    q = q.reshape(B, N, num_heads, dh).transpose(0, 2, 1, 3) / math.sqrt(dh)
    k = k.reshape(B, N, num_heads, dh).transpose(0, 2, 1, 3)
    v = v.reshape(B, N, num_heads, dh).transpose(0, 2, 1, 3)
    s = jnp.einsum('bhld,bhsd->bhls', q, k)
    p = jax.nn.softmax(s, axis=-1)
    o = jnp.einsum('bhls,bhsd->bhld', p, v).transpose(0, 2, 1, 3).reshape(B, N, P)
    return o @ params['w_out_t'] + params['b_out'][0] + x


# -------------------------------------------------------------------- main --

if __name__ == "__main__":
    B, N, P_dim, num_heads = 2, 16, 32, 4

    key = jax.random.PRNGKey(0)
    k1, k2, k3, k4, k5, k6, kx = jax.random.split(key, 7)

    # Raw params in PyTorch layout (then preprocessed once).
    raw = {
        'ln_g': 1.0 + 0.1 * jax.random.normal(k1, (P_dim,), jnp.float32),
        'ln_b': 0.1 * jax.random.normal(k2, (P_dim,), jnp.float32),
        'in_proj_weight': 0.1 * jax.random.normal(k3, (3 * P_dim, P_dim), jnp.float32),
        'in_proj_bias': 0.1 * jax.random.normal(k4, (3 * P_dim,), jnp.float32),
        'out_proj_weight': 0.1 * jax.random.normal(k5, (P_dim, P_dim), jnp.float32),
        'out_proj_bias': 0.1 * jax.random.normal(k6, (P_dim,), jnp.float32),
    }
    params = preprocess_params(raw)

    P_feature = jax.random.normal(kx, (B, N, P_dim), jnp.float32)

    fwd = jax.jit(functools.partial(sacluster_forward, num_heads=num_heads))
    out = fwd(P_feature, params)
    jax.block_until_ready(out)

    ref = reference_sacluster(P_feature, params, num_heads)
    max_err = float(jnp.max(jnp.abs(out - ref)))

    assert out.shape == (B, N, P_dim)
    # Loose tolerance only guards against real bugs; it absorbs any
    # XLA-vs-Mosaic f32 matmul precision-mode differences on TPU.
    assert jnp.allclose(out, ref, atol=2e-2, rtol=2e-2), f"max err {max_err}"

    # TODO(synk): nn.Dropout is treated as identity (eval-mode semantics).
    print("KERNEL_OK")
</pallas_src>

<mosaic_0001>
module attributes {stable_mosaic.version = 11 : i64} {
  func.func @_sacluster_kernel(%arg0: i32, %arg1: memref<1x16x32xf32, #tpu.memory_space<vmem>>, %arg2: memref<1x32xf32, #tpu.memory_space<vmem>>, %arg3: memref<1x32xf32, #tpu.memory_space<vmem>>, %arg4: memref<32x96xf32, #tpu.memory_space<vmem>>, %arg5: memref<1x96xf32, #tpu.memory_space<vmem>>, %arg6: memref<32x32xf32, #tpu.memory_space<vmem>>, %arg7: memref<1x32xf32, #tpu.memory_space<vmem>>, %arg8: memref<1x16x32xf32, #tpu.memory_space<vmem>>) attributes {dimension_semantics = [#tpu.dimension_semantics<parallel>], iteration_bounds = array<i64: 2>, scalar_prefetch = 0 : i64, scratch_operands = 0 : i64, tpu.core_type = #tpu.core_type<tc>, window_params = [{transform_indices = @transform_0, window_bounds = array<i64: 1, 16, 32>}, {pipeline_mode = #tpu.pipeline_mode<synchronous>, transform_indices = @transform_1, window_bounds = array<i64: 1, 32>}, {pipeline_mode = #tpu.pipeline_mode<synchronous>, transform_indices = @transform_2, window_bounds = array<i64: 1, 32>}, {pipeline_mode = #tpu.pipeline_mode<synchronous>, transform_indices = @transform_3, window_bounds = array<i64: 32, 96>}, {pipeline_mode = #tpu.pipeline_mode<synchronous>, transform_indices = @transform_4, window_bounds = array<i64: 1, 96>}, {pipeline_mode = #tpu.pipeline_mode<synchronous>, transform_indices = @transform_5, window_bounds = array<i64: 32, 32>}, {pipeline_mode = #tpu.pipeline_mode<synchronous>, transform_indices = @transform_6, window_bounds = array<i64: 1, 32>}, {transform_indices = @transform_7, window_bounds = array<i64: 1, 16, 32>}]} {
    %c0 = arith.constant 0 : index
    %c0_0 = arith.constant 0 : index
    %c0_1 = arith.constant 0 : index
    %0 = vector.load %arg1[%c0, %c0_0, %c0_1] : memref<1x16x32xf32, #tpu.memory_space<vmem>>, vector<1x16x32xf32>
    %1 = vector.shape_cast %0 : vector<1x16x32xf32> to vector<16x32xf32>
    %cst = arith.constant dense<0.000000e+00> : vector<16xf32>
    %2 = vector.multi_reduction <add>, %1, %cst [1] : vector<16x32xf32> to vector<16xf32>
    %3 = vector.shape_cast %2 : vector<16xf32> to vector<16x1xf32>
    %cst_2 = arith.constant 3.200000e+01 : f32
    %4 = vector.broadcast %cst_2 : f32 to vector<16x1xf32>
    %5 = arith.divf %3, %4 : vector<16x1xf32>
    %6 = vector.broadcast %5 : vector<16x1xf32> to vector<16x32xf32>
    %7 = arith.subf %1, %6 : vector<16x32xf32>
    %8 = arith.mulf %7, %7 : vector<16x32xf32>
    %cst_3 = arith.constant dense<0.000000e+00> : vector<16xf32>
    %9 = vector.multi_reduction <add>, %8, %cst_3 [1] : vector<16x32xf32> to vector<16xf32>
    %10 = vector.shape_cast %9 : vector<16xf32> to vector<16x1xf32>
    %cst_4 = arith.constant 3.200000e+01 : f32
    %11 = vector.broadcast %cst_4 : f32 to vector<16x1xf32>
    %12 = arith.divf %10, %11 : vector<16x1xf32>
    %cst_5 = arith.constant 9.99999974E-6 : f32
    %13 = vector.broadcast %cst_5 : f32 to vector<16x1xf32>
    %14 = arith.addf %12, %13 : vector<16x1xf32>
    %15 = math.rsqrt %14 : vector<16x1xf32>
    %16 = vector.broadcast %15 : vector<16x1xf32> to vector<16x32xf32>
    %17 = arith.mulf %7, %16 : vector<16x32xf32>
    %c0_6 = arith.constant 0 : index
    %c0_7 = arith.constant 0 : index
    %18 = vector.load %arg2[%c0_6, %c0_7] : memref<1x32xf32, #tpu.memory_space<vmem>>, vector<1x32xf32>
    %19 = vector.broadcast %18 : vector<1x32xf32> to vector<16x32xf32>
    %20 = arith.mulf %17, %19 : vector<16x32xf32>
    %c0_8 = arith.constant 0 : index
    %c0_9 = arith.constant 0 : index
    %21 = vector.load %arg3[%c0_8, %c0_9] : memref<1x32xf32, #tpu.memory_space<vmem>>, vector<1x32xf32>
    %22 = vector.broadcast %21 : vector<1x32xf32> to vector<16x32xf32>
    %23 = arith.addf %20, %22 : vector<16x32xf32>
    %c0_10 = arith.constant 0 : index
    %c0_11 = arith.constant 0 : index
    %24 = vector.load %arg4[%c0_10, %c0_11] : memref<32x96xf32, #tpu.memory_space<vmem>>, vector<32x96xf32>
    %cst_12 = arith.constant dense<0.000000e+00> : vector<16x96xf32>
    %25 = tpu.matmul %23, %24, %cst_12 {dimension_numbers = #tpu.dot_dimension_numbers<[1], [0], [0], [1], [0, 0, 1, 1], [], []>} : vector<16x32xf32>, vector<32x96xf32>, vector<16x96xf32> -> vector<16x96xf32>
    %c0_13 = arith.constant 0 : index
    %c0_14 = arith.constant 0 : index
    %26 = vector.load %arg5[%c0_13, %c0_14] : memref<1x96xf32, #tpu.memory_space<vmem>>, vector<1x96xf32>
    %27 = vector.broadcast %26 : vector<1x96xf32> to vector<16x96xf32>
    %28 = arith.addf %25, %27 : vector<16x96xf32>
    %c0_15 = arith.constant 0 : index
    %c0_16 = arith.constant 0 : index
    %29 = vector.load %arg6[%c0_15, %c0_16] : memref<32x32xf32, #tpu.memory_space<vmem>>, vector<32x32xf32>
    %cst_17 = arith.constant 0.000000e+00 : f32
    %30 = vector.broadcast %cst_17 : f32 to vector<16x32xf32>
    %31 = vector.extract_strided_slice %28 {offsets = [0, 0], sizes = [16, 8], strides = [1, 1]} : vector<16x96xf32> to vector<16x8xf32>
    %cst_18 = arith.constant 0.353553385 : f32
    %32 = vector.broadcast %cst_18 : f32 to vector<16x8xf32>
    %33 = arith.mulf %31, %32 : vector<16x8xf32>
    %34 = vector.extract_strided_slice %28 {offsets = [0, 32], sizes = [16, 8], strides = [1, 1]} : vector<16x96xf32> to vector<16x8xf32>
    %35 = vector.extract_strided_slice %28 {offsets = [0, 64], sizes = [16, 8], strides = [1, 1]} : vector<16x96xf32> to vector<16x8xf32>
    %36 = tpu.transpose %34, [1, 0] : vector<16x8xf32> -> vector<8x16xf32>
    %cst_19 = arith.constant dense<0.000000e+00> : vector<16x16xf32>
    %37 = tpu.matmul %33, %36, %cst_19 {dimension_numbers = #tpu.dot_dimension_numbers<[1], [0], [0], [1], [0, 0, 1, 1], [], []>} : vector<16x8xf32>, vector<8x16xf32>, vector<16x16xf32> -> vector<16x16xf32>
    %cst_20 = arith.constant dense<0xFF800000> : vector<16xf32>
    %38 = vector.multi_reduction <maximumf>, %37, %cst_20 [1] : vector<16x16xf32> to vector<16xf32>
    %39 = vector.shape_cast %38 : vector<16xf32> to vector<16x1xf32>
    %40 = vector.broadcast %39 : vector<16x1xf32> to vector<16x16xf32>
    %41 = arith.subf %37, %40 : vector<16x16xf32>
    %42 = math.exp %41 : vector<16x16xf32>
    %cst_21 = arith.constant dense<0.000000e+00> : vector<16xf32>
    %43 = vector.multi_reduction <add>, %42, %cst_21 [1] : vector<16x16xf32> to vector<16xf32>
    %44 = vector.shape_cast %43 : vector<16xf32> to vector<16x1xf32>
    %45 = vector.broadcast %44 : vector<16x1xf32> to vector<16x16xf32>
    %46 = arith.divf %42, %45 : vector<16x16xf32>
    %cst_22 = arith.constant dense<0.000000e+00> : vector<16x8xf32>
    %47 = tpu.matmul %46, %35, %cst_22 {dimension_numbers = #tpu.dot_dimension_numbers<[1], [0], [0], [1], [0, 0, 1, 1], [], []>} : vector<16x16xf32>, vector<16x8xf32>, vector<16x8xf32> -> vector<16x8xf32>
    %48 = vector.extract_strided_slice %29 {offsets = [0, 0], sizes = [8, 32], strides = [1, 1]} : vector<32x32xf32> to vector<8x32xf32>
    %cst_23 = arith.constant dense<0.000000e+00> : vector<16x32xf32>
    %49 = tpu.matmul %47, %48, %cst_23 {dimension_numbers = #tpu.dot_dimension_numbers<[1], [0], [0], [1], [0, 0, 1, 1], [], []>} : vector<16x8xf32>, vector<8x32xf32>, vector<16x32xf32> -> vector<16x32xf32>
    %50 = arith.addf %30, %49 : vector<16x32xf32>
    %51 = vector.extract_strided_slice %28 {offsets = [0, 8], sizes = [16, 8], strides = [1, 1]} : vector<16x96xf32> to vector<16x8xf32>
    %cst_24 = arith.constant 0.353553385 : f32
    %52 = vector.broadcast %cst_24 : f32 to vector<16x8xf32>
    %53 = arith.mulf %51, %52 : vector<16x8xf32>
    %54 = vector.extract_strided_slice %28 {offsets = [0, 40], sizes = [16, 8], strides = [1, 1]} : vector<16x96xf32> to vector<16x8xf32>
    %55 = vector.extract_strided_slice %28 {offsets = [0, 72], sizes = [16, 8], strides = [1, 1]} : vector<16x96xf32> to vector<16x8xf32>
    %56 = tpu.transpose %54, [1, 0] : vector<16x8xf32> -> vector<8x16xf32>
    %cst_25 = arith.constant dense<0.000000e+00> : vector<16x16xf32>
    %57 = tpu.matmul %53, %56, %cst_25 {dimension_numbers = #tpu.dot_dimension_numbers<[1], [0], [0], [1], [0, 0, 1, 1], [], []>} : vector<16x8xf32>, vector<8x16xf32>, vector<16x16xf32> -> vector<16x16xf32>
    %cst_26 = arith.constant dense<0xFF800000> : vector<16xf32>
    %58 = vector.multi_reduction <maximumf>, %57, %cst_26 [1] : vector<16x16xf32> to vector<16xf32>
    %59 = vector.shape_cast %58 : vector<16xf32> to vector<16x1xf32>
    %60 = vector.broadcast %59 : vector<16x1xf32> to vector<16x16xf32>
    %61 = arith.subf %57, %60 : vector<16x16xf32>
    %62 = math.exp %61 : vector<16x16xf32>
    %cst_27 = arith.constant dense<0.000000e+00> : vector<16xf32>
    %63 = vector.multi_reduction <add>, %62, %cst_27 [1] : vector<16x16xf32> to vector<16xf32>
    %64 = vector.shape_cast %63 : vector<16xf32> to vector<16x1xf32>
    %65 = vector.broadcast %64 : vector<16x1xf32> to vector<16x16xf32>
    %66 = arith.divf %62, %65 : vector<16x16xf32>
    %cst_28 = arith.constant dense<0.000000e+00> : vector<16x8xf32>
    %67 = tpu.matmul %66, %55, %cst_28 {dimension_numbers = #tpu.dot_dimension_numbers<[1], [0], [0], [1], [0, 0, 1, 1], [], []>} : vector<16x16xf32>, vector<16x8xf32>, vector<16x8xf32> -> vector<16x8xf32>
    %68 = vector.extract_strided_slice %29 {offsets = [8, 0], sizes = [8, 32], strides = [1, 1]} : vector<32x32xf32> to vector<8x32xf32>
    %cst_29 = arith.constant dense<0.000000e+00> : vector<16x32xf32>
    %69 = tpu.matmul %67, %68, %cst_29 {dimension_numbers = #tpu.dot_dimension_numbers<[1], [0], [0], [1], [0, 0, 1, 1], [], []>} : vector<16x8xf32>, vector<8x32xf32>, vector<16x32xf32> -> vector<16x32xf32>
    %70 = arith.addf %50, %69 : vector<16x32xf32>
    %71 = vector.extract_strided_slice %28 {offsets = [0, 16], sizes = [16, 8], strides = [1, 1]} : vector<16x96xf32> to vector<16x8xf32>
    %cst_30 = arith.constant 0.353553385 : f32
    %72 = vector.broadcast %cst_30 : f32 to vector<16x8xf32>
    %73 = arith.mulf %71, %72 : vector<16x8xf32>
    %74 = vector.extract_strided_slice %28 {offsets = [0, 48], sizes = [16, 8], strides = [1, 1]} : vector<16x96xf32> to vector<16x8xf32>
    %75 = vector.extract_strided_slice %28 {offsets = [0, 80], sizes = [16, 8], strides = [1, 1]} : vector<16x96xf32> to vector<16x8xf32>
    %76 = tpu.transpose %74, [1, 0] : vector<16x8xf32> -> vector<8x16xf32>
    %cst_31 = arith.constant dense<0.000000e+00> : vector<16x16xf32>
    %77 = tpu.matmul %73, %76, %cst_31 {dimension_numbers = #tpu.dot_dimension_numbers<[1], [0], [0], [1], [0, 0, 1, 1], [], []>} : vector<16x8xf32>, vector<8x16xf32>, vector<16x16xf32> -> vector<16x16xf32>
    %cst_32 = arith.constant dense<0xFF800000> : vector<16xf32>
    %78 = vector.multi_reduction <maximumf>, %77, %cst_32 [1] : vector<16x16xf32> to vector<16xf32>
    %79 = vector.shape_cast %78 : vector<16xf32> to vector<16x1xf32>
    %80 = vector.broadcast %79 : vector<16x1xf32> to vector<16x16xf32>
    %81 = arith.subf %77, %80 : vector<16x16xf32>
    %82 = math.exp %81 : vector<16x16xf32>
    %cst_33 = arith.constant dense<0.000000e+00> : vector<16xf32>
    %83 = vector.multi_reduction <add>, %82, %cst_33 [1] : vector<16x16xf32> to vector<16xf32>
    %84 = vector.shape_cast %83 : vector<16xf32> to vector<16x1xf32>
    %85 = vector.broadcast %84 : vector<16x1xf32> to vector<16x16xf32>
    %86 = arith.divf %82, %85 : vector<16x16xf32>
    %cst_34 = arith.constant dense<0.000000e+00> : vector<16x8xf32>
    %87 = tpu.matmul %86, %75, %cst_34 {dimension_numbers = #tpu.dot_dimension_numbers<[1], [0], [0], [1], [0, 0, 1, 1], [], []>} : vector<16x16xf32>, vector<16x8xf32>, vector<16x8xf32> -> vector<16x8xf32>
    %88 = vector.extract_strided_slice %29 {offsets = [16, 0], sizes = [8, 32], strides = [1, 1]} : vector<32x32xf32> to vector<8x32xf32>
    %cst_35 = arith.constant dense<0.000000e+00> : vector<16x32xf32>
    %89 = tpu.matmul %87, %88, %cst_35 {dimension_numbers = #tpu.dot_dimension_numbers<[1], [0], [0], [1], [0, 0, 1, 1], [], []>} : vector<16x8xf32>, vector<8x32xf32>, vector<16x32xf32> -> vector<16x32xf32>
    %90 = arith.addf %70, %89 : vector<16x32xf32>
    %91 = vector.extract_strided_slice %28 {offsets = [0, 24], sizes = [16, 8], strides = [1, 1]} : vector<16x96xf32> to vector<16x8xf32>
    %cst_36 = arith.constant 0.353553385 : f32
    %92 = vector.broadcast %cst_36 : f32 to vector<16x8xf32>
    %93 = arith.mulf %91, %92 : vector<16x8xf32>
    %94 = vector.extract_strided_slice %28 {offsets = [0, 56], sizes = [16, 8], strides = [1, 1]} : vector<16x96xf32> to vector<16x8xf32>
    %95 = vector.extract_strided_slice %28 {offsets = [0, 88], sizes = [16, 8], strides = [1, 1]} : vector<16x96xf32> to vector<16x8xf32>
    %96 = tpu.transpose %94, [1, 0] : vector<16x8xf32> -> vector<8x16xf32>
    %cst_37 = arith.constant dense<0.000000e+00> : vector<16x16xf32>
    %97 = tpu.matmul %93, %96, %cst_37 {dimension_numbers = #tpu.dot_dimension_numbers<[1], [0], [0], [1], [0, 0, 1, 1], [], []>} : vector<16x8xf32>, vector<8x16xf32>, vector<16x16xf32> -> vector<16x16xf32>
    %cst_38 = arith.constant dense<0xFF800000> : vector<16xf32>
    %98 = vector.multi_reduction <maximumf>, %97, %cst_38 [1] : vector<16x16xf32> to vector<16xf32>
    %99 = vector.shape_cast %98 : vector<16xf32> to vector<16x1xf32>
    %100 = vector.broadcast %99 : vector<16x1xf32> to vector<16x16xf32>
    %101 = arith.subf %97, %100 : vector<16x16xf32>
    %102 = math.exp %101 : vector<16x16xf32>
    %cst_39 = arith.constant dense<0.000000e+00> : vector<16xf32>
    %103 = vector.multi_reduction <add>, %102, %cst_39 [1] : vector<16x16xf32> to vector<16xf32>
    %104 = vector.shape_cast %103 : vector<16xf32> to vector<16x1xf32>
    %105 = vector.broadcast %104 : vector<16x1xf32> to vector<16x16xf32>
    %106 = arith.divf %102, %105 : vector<16x16xf32>
    %cst_40 = arith.constant dense<0.000000e+00> : vector<16x8xf32>
    %107 = tpu.matmul %106, %95, %cst_40 {dimension_numbers = #tpu.dot_dimension_numbers<[1], [0], [0], [1], [0, 0, 1, 1], [], []>} : vector<16x16xf32>, vector<16x8xf32>, vector<16x8xf32> -> vector<16x8xf32>
    %108 = vector.extract_strided_slice %29 {offsets = [24, 0], sizes = [8, 32], strides = [1, 1]} : vector<32x32xf32> to vector<8x32xf32>
    %cst_41 = arith.constant dense<0.000000e+00> : vector<16x32xf32>
    %109 = tpu.matmul %107, %108, %cst_41 {dimension_numbers = #tpu.dot_dimension_numbers<[1], [0], [0], [1], [0, 0, 1, 1], [], []>} : vector<16x8xf32>, vector<8x32xf32>, vector<16x32xf32> -> vector<16x32xf32>
    %110 = arith.addf %90, %109 : vector<16x32xf32>
    %c0_42 = arith.constant 0 : index
    %c0_43 = arith.constant 0 : index
    %111 = vector.load %arg7[%c0_42, %c0_43] : memref<1x32xf32, #tpu.memory_space<vmem>>, vector<1x32xf32>
    %112 = vector.broadcast %111 : vector<1x32xf32> to vector<16x32xf32>
    %113 = arith.addf %110, %112 : vector<16x32xf32>
    %114 = arith.addf %113, %1 : vector<16x32xf32>
    %c0_44 = arith.constant 0 : index
    %c0_45 = arith.constant 0 : index
    %c0_46 = arith.constant 0 : index
    %115 = vector.load %arg8[%c0_44, %c0_45, %c0_46] : memref<1x16x32xf32, #tpu.memory_space<vmem>>, vector<1x16x32xf32>
    %116 = vector.shape_cast %115 : vector<1x16x32xf32> to vector<16x32xf32>
    %117 = vector.shape_cast %114 : vector<16x32xf32> to vector<1x16x32xf32>
    tpu.vector_store %arg8[%c0_44, %c0_45, %c0_46], %117 {strides = array<i32>} : memref<1x16x32xf32, #tpu.memory_space<vmem>>, vector<1x16x32xf32>,
    return
  }
  func.func @transform_0(%arg0: i32) -> (i32, i32, i32) {
    %c0_i32 = arith.constant 0 : i32
    %c0_i32_0 = arith.constant 0 : i32
    %c0_i32_1 = arith.constant 0 : i32
    return %arg0, %c0_i32, %c0_i32_0 : i32, i32, i32
  }
  func.func @transform_1(%arg0: i32) -> (i32, i32) {
    %c0_i32 = arith.constant 0 : i32
    %c0_i32_0 = arith.constant 0 : i32
    %c0_i32_1 = arith.constant 0 : i32
    return %c0_i32, %c0_i32_0 : i32, i32
  }
  func.func @transform_2(%arg0: i32) -> (i32, i32) {
    %c0_i32 = arith.constant 0 : i32
    %c0_i32_0 = arith.constant 0 : i32
    %c0_i32_1 = arith.constant 0 : i32
    return %c0_i32, %c0_i32_0 : i32, i32
  }
  func.func @transform_3(%arg0: i32) -> (i32, i32) {
    %c0_i32 = arith.constant 0 : i32
    %c0_i32_0 = arith.constant 0 : i32
    %c0_i32_1 = arith.constant 0 : i32
    return %c0_i32, %c0_i32_0 : i32, i32
  }
  func.func @transform_4(%arg0: i32) -> (i32, i32) {
    %c0_i32 = arith.constant 0 : i32
    %c0_i32_0 = arith.constant 0 : i32
    %c0_i32_1 = arith.constant 0 : i32
    return %c0_i32, %c0_i32_0 : i32, i32
  }
  func.func @transform_5(%arg0: i32) -> (i32, i32) {
    %c0_i32 = arith.constant 0 : i32
    %c0_i32_0 = arith.constant 0 : i32
    %c0_i32_1 = arith.constant 0 : i32
    return %c0_i32, %c0_i32_0 : i32, i32
  }
  func.func @transform_6(%arg0: i32) -> (i32, i32) {
    %c0_i32 = arith.constant 0 : i32
    %c0_i32_0 = arith.constant 0 : i32
    %c0_i32_1 = arith.constant 0 : i32
    return %c0_i32, %c0_i32_0 : i32, i32
  }
  func.func @transform_7(%arg0: i32) -> (i32, i32, i32) {
    %c0_i32 = arith.constant 0 : i32
    %c0_i32_0 = arith.constant 0 : i32
    %c0_i32_1 = arith.constant 0 : i32
    return %arg0, %c0_i32, %c0_i32_0 : i32, i32, i32
  }
}

</mosaic_0001>

<bundles_post_ra>
// kernel: sacluster_forward.1
= control target key start
LH: loop header
LB: loop body
LE: loop exit
PB: predicated region body
PF: predicated region fallthrough
CT: control target
= control target key end

     0   :  { %s2645_s0 = inlined_call_operand.hbm [shape: f32[2,16,32], index: 0, kind: input, shape index: {}]   ;;  %s2646_s1 = inlined_call_operand.vmem [shape: f32[1,32], index: 1, kind: input, shape index: {}]   ;;  %s2647_s2 = inlined_call_operand.vmem [shape: f32[1,32], index: 2, kind: input, shape index: {}]   ;;  %s2648_s3 = inlined_call_operand.hbm [shape: f32[32,96], index: 3, kind: input, shape index: {}]   ;;  %s2649_s4 = inlined_call_operand.hbm [shape: f32[1,96], index: 4, kind: input, shape index: {}]   ;;  %s2650_s5 = inlined_call_operand.hbm [shape: f32[32,32], index: 5, kind: input, shape index: {}]   ;;  %s2651_s6 = inlined_call_operand.vmem [shape: f32[1,32], index: 6, kind: input, shape index: {}]   ;;  %s2652_s7 = inlined_call_operand.hbm [shape: f32[2,16,32], index: 7, kind: output, shape index: {}]  }
   0x1   :  { %2659 = sst [smem:[#allocation15_spill]] %s2648_s3 }
   0x2   :  { %12 = vsyncpa [#allocation3], 0 }
   0x3   :  { %14 = vsyncpa [#allocation3 + $0x1], 0 }
   0x4   :  { %15 = vsyncpa [#allocation6], 0 }
   0x5   :  { %16 = vsyncpa [#allocation9], 0 }
   0x6   :  { %17 = vsyncpa [#allocation4], 0 }
   0x7   :  { %19 = vsyncpa [#allocation4 + $0x1], 0  ;;  %s2309_s24 = smov 0   ;;  %s2311_s25 = smov 0  }
   0x8   :  { %s2313_s26 = smov 0   ;;  %s2315_s27 = smov 0  }
   0x9 LB: > { %s2330_s28 = sadd.s32 4294967295, %s2247_s27   ;;  %s1744_s29 = sadd.s32 4294967294, %s2247_s27   ;;  %s2247_s27 = sphi %s2315_s27, %s2682_s27   ;;  %s2243_s26 = sphi %s2313_s26, %s2681_s26   ;;  %s2239_s25 = sphi %s2311_s25, %s2680_s25   ;;  %s2235_s24 = sphi %s2309_s24, %s2679_s24  }
   0xa   : > { %p45_p0 = scmp.ne.s32.totalorder %s2239_s25, %s2235_s24  ;;  %p2653_p1 = scmp.eq.s32.totalorder %s2330_s28, 0 }
   0xb   : > { %p201_p3 = scmp.eq.s32.totalorder %s1744_s29, 1  ;;  %p1745_p5 = scmp.ge.s32.totalorder %s2247_s27, 1 }
   0xc   : > { %p2339_p4 = por %p2653_p1, %p45_p0  ;;  %p208_p7 = scmp.lt.s32.totalorder %s2247_s27, 3 }
   0xd   : > { %p2344_p6 = por %p201_p3, %p45_p0  ;;  %s2249_s10 = smov [#allocation5]  }
   0xe   : > { %s2660_s30 = scalar_select %p2339_p4, 1, 0 }
   0xf   : > { %s2661_s8 = scalar_select %p2344_p6, 1, 0 }
  0x10   : > { %p2349_p8 = pnand %p1745_p5, %p208_p7  ;;  %s226_s11 = sshll.u32 %s2249_s10, 4  ;;  %s227_s11 = int_to_ptr.vmem [resolvable:$true] %s226_s11 }
  0x11   : > { %s2250_s13 = smov [#allocation7]   ;;  %s2251_s15 = smov [#allocation8]  }
  0x12   : > { %s2662_s9 = scalar_select %p2349_p8, 1, 0 }
  0x13   : > { %p1957_p9 = pneg %p2349_p8  ;;  %s240_s14 = sshll.u32 %s2250_s13, 4  ;;  %s241_s14 = int_to_ptr.vmem [resolvable:$true] %s240_s14 }
  0x14   : > { %s250_s16 = sshll.u32 %s2251_s15, 4  ;;  %s2080_s17 = scalar_lea.vmem %s227_s11, 512  ;;  %s251_s16 = int_to_ptr.vmem [resolvable:$true] %s250_s16 }
  0x15   : > { %p2358_p11 = pnand %p1957_p9, %p2653_p1  ;;  %p2081_p13 = scmp.ne.s32.totalorder %s227_s11, %s2080_s17 }
  0x16   : > { %p2088_p5 = scmp.lt.s32.totalorder %s227_s11, %s227_s11  ;;  %p2089_p7 = scmp.lt.s32.totalorder %s2080_s17, %s2080_s17 }
  0x17   : > { %p2071_p12 = pneg %p2358_p11 }
  0x18   : > { %p2090_p9 = por %p2089_p7, %p2088_p5 }
  0x19   : > { %p2083_p0 = pnand %p2081_p13, %p2071_p12 }
  0x1b   : > { %p2084_p3 = pneg %p2083_p0 }
  0x1d   : > { %p2091_p10 = pnand %p2090_p9, %p2084_p3 }
  0x1f   : > { %2094 = shalt.err (!%p2091_p10)
}
  0x20   : > { %s2655_s18 = smov 128   ;;  %s2656_s19 = smov 8  }
  0x21   : > { %s2664_s3 = sld [smem:[#allocation15_spill]]  ;;  %s2106_s22 = scalar_lea.vmem %s241_s14, 16 }
  0x22   : > { %p2107_p13 = scmp.ne.s32.totalorder %s241_s14, %s2106_s22  ;;  %s2113_s23 = scalar_lea.vmem %s241_s14, 32 }
  0x23   : > { %p2114_p10 = scmp.lt.s32.totalorder %s241_s14, %s241_s14  ;;  %p2115_p3 = scmp.lt.s32.totalorder %s2113_s23, %s2106_s22 }
  0x24   : > { %p2109_p0 = pnand %p2107_p13, %p2071_p12 }
  0x25   : > { %p2116_p7 = por %p2115_p3, %p2114_p10 }
  0x26   : > { %p2110_p5 = pneg %p2109_p0 }
  0x27   : > { %1960 = dma.hbm_to_vmem [thread:$0]  (!%p2358_p11), %s2664_s3, 512, %s227_s11, [#allocation6], %s2655_s18, %s2655_s18, %s2656_s19  }
  0x28   : > { %p2117_p9 = pnand %p2116_p7, %p2110_p5 }
  0x2a   : > { %2120 = shalt.err (!%p2117_p9)
}
  0x2b   : > { %1963 = dma.hbm_to_vmem [thread:$0]  (!%p2358_p11), %s2649_s4, 16, %s241_s14, [#allocation6]  }
  0x2c   : > { %s2132_s11 = scalar_lea.vmem %s251_s16, 512  ;;  %p2140_p2 = scmp.lt.s32.totalorder %s251_s16, %s251_s16 }
  0x2d   : > { %p2133_p1 = scmp.ne.s32.totalorder %s251_s16, %s2132_s11  ;;  %p2141_p6 = scmp.lt.s32.totalorder %s2132_s11, %s2132_s11 }
  0x2f   : > { %p2135_p13 = pnand %p2133_p1, %p2071_p12  ;;  %p2142_p4 = por %p2141_p6, %p2140_p2 }
  0x31   : > { %p2136_p0 = pneg %p2135_p13 }
  0x33   : > { %p2143_p10 = pnand %p2142_p4, %p2136_p0 }
  0x35   : > { %2146 = shalt.err (!%p2143_p10)
}
  0x36   : > { %1966 = dma.hbm_to_vmem [thread:$0]  (!%p2358_p11), %s2650_s5, 512, %s251_s16, [#allocation9], %s2655_s18, %s2655_s18, %s2656_s19  }
  0x37   : > { %s2395_s14 = sadd.s32 1, %s2247_s27   ;;  %s32_s17 = sadd.s32 1, %s2243_s26 }
  0x38   : > { %s29_s12 = ssub.s32 %s2247_s27, %s2395_s14  ;;  %p39_p2 = scmp.ne.s32.totalorder %s2243_s26, %s2239_s25 }
  0x39   : > { %p30_p1 = scmp.eq.s32.totalorder %s29_s12, 0  ;;  %p40_p4 = scmp.eq.s32.totalorder %s2247_s27, 0 }
  0x3a   : > { %p1978_p6 = scmp.lt.s32.totalorder %s2247_s27, 2  ;;  %p2665_p5 = scmp.eq.s32.totalorder %s2330_s28, 1 }
  0x3b   : > { %s2405_s20 = scalar_select %p30_p1, %s2243_s26, %s32_s17  }
  0x3c   : > { %p41_p12 = por %p40_p4, %p39_p2  ;;  %p2409_p3 = por %p2665_p5, %p39_p2 }
  0x3d   : > { %s267_s22 = sand.u32 1, %s2243_s26   ;;  %s1802_s23 = sshll.u32 %s2247_s27, 8 }
  0x3e   : > { %s2666_s21 = scalar_select %p2409_p3, 1, 0 }
  0x3f   : > { %s1750_s16 = sshll.u32 %s267_s22, 4  ;;  %s2418_s11 = scalar_lea.hbm %s2645_s0, %s1802_s23 }
  0x40   : > { %s271_s13 = scalar_lea.vmem [#allocation2], %s1750_s16  ;;  %p2420_p11 = pnand %p1978_p6, %p41_p12 }
  0x41   : > { %s278_s15 = sshll.u32 %s271_s13, 4  ;;  %s2426_s17 = scalar_lea.sflag [#allocation3], %s267_s22  ;;  %s2424_s15 = int_to_ptr.vmem [resolvable:$true] %s278_s15 }
  0x42   : > { %s2147_s18 = scalar_lea.hbm %s2418_s11, 256  ;;  %p2149_p9 = pneg %p2420_p11 }
  0x43   : > { %p2148_p7 = scmp.ne.s32.totalorder %s2418_s11, %s2147_s18  ;;  %s2152_s16 = scalar_lea.hbm %s2645_s0, 512 }
  0x44   : > { %p2153_p10 = scmp.lt.s32.totalorder %s2418_s11, %s2645_s0  ;;  %p2154_p1 = scmp.lt.s32.totalorder %s2152_s16, %s2147_s18 }
  0x45   : > { %p2150_p13 = pnand %p2149_p9, %p2148_p7 }
  0x46   : > { %p2155_p2 = por %p2154_p1, %p2153_p10 }
  0x47   : > { %p2151_p0 = pneg %p2150_p13 }
  0x49   : > { %p2156_p4 = pnand %p2155_p2, %p2151_p0 }
  0x4b   : > { %2159 = shalt.err (!%p2156_p4)
}
  0x4c   : > { %s2160_s22 = scalar_lea.vmem %s2424_s15, 256  ;;  %s2254_s19 = smov [#allocation2]  }
  0x4d   : > { %p2161_p6 = scmp.ne.s32.totalorder %s2424_s15, %s2160_s22  ;;  %s2165_s3 = sshll.u32 %s2254_s19, 4  ;;  %s2166_s3 = int_to_ptr.vmem [resolvable:$false] %s2165_s3 }
  0x4e   : > { %s2167_s23 = scalar_lea.vmem %s2166_s3, 512  ;;  %p2168_p7 = scmp.lt.s32.totalorder %s2424_s15, %s2166_s3 }
  0x4f   : > { %p2163_p12 = pnand %p2161_p6, %p2149_p9  ;;  %p2169_p13 = scmp.lt.s32.totalorder %s2167_s23, %s2160_s22 }
  0x51   : > { %p2164_p5 = pneg %p2163_p12  ;;  %p2170_p3 = por %p2169_p13, %p2168_p7 }
  0x53   : > { %p2171_p8 = pnand %p2170_p3, %p2164_p5 }
  0x55   : > { %2174 = shalt.err (!%p2171_p8)
}
  0x56   : > { %s2668_s18 = smov 8   ;;  %s2669_s29 = smov 128  }
  0x57   : > { %1970 = dma.hbm_to_vmem [thread:$0]  (!%p2420_p11), %s2418_s11, 256, %s2424_s15, %s2426_s17, %s2669_s29, %s2669_s29, %s2668_s18  }
  0x58   : > { %p2670_p9 = scmp.ne.s32.totalorder %s2662_s9, 0 }
  0x59   : > { %s2453_s19 = sand.u32 (!%p2670_p9), 1, %s2239_s25   ;;  %p2671_p8 = scmp.ne.s32.totalorder (!%p2670_p9), %s2660_s30, 0 }
  0x5a   : > { %290 = sbr.rel (%p2670_p9) target bundleno = 2586 (0xa1a), region = 48  ;;  %s1754_s3 = sshll.u32 (!%p2670_p9), %s2453_s19, 4 }
  0x5b   : > { %s293_s16 = scalar_lea.sflag (!%p2670_p9), [#allocation3], %s2453_s19  ;;  %s296_s12 = scalar_lea.vmem (!%p2670_p9), [#allocation2], %s1754_s3 }
  0x5f   : > { %2218 = dma.done.wait (%p2671_p8), %s293_s16, 256  }
  0x60   : > { %2220 = vsyncadd (%p2671_p8), %s293_s16, 4294967040  ;;  %p2672_p3 = scmp.eq.s32.totalorder %s2330_s28, 0 }
  0x62   : > { %2222 = dma.done.wait (%p2672_p3), [#allocation6], 528   ;;  %p2673_p11 = pmov %p2672_p3 }
  0x63   : > { %p2674_p0 = pmov %p2672_p3 }
  0x64   : > { %2224 = vsyncadd (%p2673_p11), [#allocation6], 4294966768 }
  0x65   : > { %2226 = dma.done.wait (%p2674_p0), [#allocation9], 512   ;;  %p2675_p10 = pmov %p2674_p0 }
  0x66   : > { %vm341_vm0 = vcmask 261120   ;;  %v2471_v0 = vld [vmem:[%s296_s12] sm:$0xff]  ;;  %v2473_v1 = vld [vmem:[%s296_s12 + $0x8] sm:$0xff]  ;;  %s2255_s17 = smov 96   ;;  %vm491_vm1 = vcmask 64512   ;;  %s2256_s10 = smov 120  }
  0x67   : > { %2228 = vsyncadd (%p2675_p10), [#allocation9], 4294966784  ;;  %v342_v2 = vsel %vm341_vm0, %v2471_v0, 0.0  ;;  %v345_v3 = vsel %vm341_vm0, %v2473_v1, 0.0  ;;  %v390_v14 = vld [vmem:[#allocation5 + $0x18] sm:$0xff]  ;;  %v389_v15 = vld [vmem:[#allocation5 + $0x10] sm:$0xff] }
  0x68   : > { %343 = vadd.xlane.f32.xlu0 %v342_v2  ;;  %1854 = vmatprep.subr.mxu0 %v390_v14  ;;  %v388_v16 = vld [vmem:[#allocation5 + $0x8] sm:$0xff]  ;;  %v387_v17 = vld [vmem:[#allocation5] sm:$0xff]  ;;  %s2257_s13 = smov 88   ;;  %vm577_vm2 = vcmask 130048   ;;  %s2258_s22 = smov 64  }
  0x69   : > { %1855 = vmatpush3.msra.mxu0 %v390_v14  ;;  %v1759_v25 = vld [vmem:[%s2646_s1] ss:$0 sm:$0xff]  ;;  %s2259_s23 = smov 56   ;;  %s2260_s18 = smov 80  }
  0x6a   : > { %1856 = vmatprep.subr.mxu0 %v389_v15  ;;  %v1760_v27 = vld [vmem:[%s2647_s2] ss:$0 sm:$0xff]  ;;  %s2261_s29 = smov 112   ;;  %s2262_s16 = smov 72  }
  0x6b   : > { %1857 = vmatpush3.msra.mxu0 %v389_v15  ;;  %v1761_v34 = vld [vmem:[#allocation7] ss:$0 sm:$0xff]  ;;  %s2263_s12 = smov 104   ;;  %s2264_s30 = smov 48  }
  0x6c   : > { %346 = vadd.xlane.f32.xlu0 %v345_v3  ;;  %1858 = vmatprep.subr.mxu0 %v388_v16  ;;  %s2265_s9 = smov 40   ;;  %p2676_p2 = scmp.ne.s32.totalorder %s2666_s21, 0 }
  0x6d   : > { %1859 = vmatpush3.msra.mxu0 %v388_v16 }
  0x6e   : > { %1860 = vmatprep.subr.mxu0 %v387_v17 }
  0x6f   : > { %1861 = vmatpush3.msra.mxu0 %v387_v17 }
  0xf1   : > { %v344_v4 = vpop.xlane.xlu0 %343 }
  0xf2   : > { %v349_v5 = vmul.f32 0.03125, %v344_v4 }
  0xf4   : > { %v351_v6 = vsub.f32 %v2471_v0, %v349_v5 }
  0xf5   : > { %v347_v7 = vpop.xlane.xlu0 %346 }
  0xf6   : > { %v350_v8 = vmul.f32 0.03125, %v347_v7  ;;  %v353_v9 = vmul.f32 %v351_v6, %v351_v6 }
  0xf8   : > { %v352_v10 = vsub.f32 %v2473_v1, %v350_v8  ;;  %v355_v11 = vsel %vm341_vm0, %v353_v9, 0.0 }
  0xf9   : > { %356 = vadd.xlane.f32.xlu1 %v355_v11 }
  0xfa   : > { %v354_v12 = vmul.f32 %v352_v10, %v352_v10 }
  0xfc   : > { %v358_v13 = vsel %vm341_vm0, %v354_v12, 0.0 }
  0xfd   : > { %359 = vadd.xlane.f32.xlu1 %v358_v13 }
 0x182   : > { %v357_v18 = vpop.xlane.xlu1 %356 }
 0x183   : > { %v361_v19 = vmul.f32 0.03125, %v357_v18 }
 0x185   : > { %v363_v20 = vadd.f32 1e-05, %v361_v19 }
 0x186   : > { %v360_v21 = vpop.xlane.xlu1 %359 }
 0x187   : > { %2033 = vrsqrt.f32 %v363_v20  ;;  %v362_v22 = vmul.f32 0.03125, %v360_v21 }
 0x189   : > { %v364_v23 = vadd.f32 1e-05, %v362_v22 }
 0x18b   : > { %2035 = vrsqrt.f32 %v364_v23 }
 0x194   : > { %v2034_v24 = vpop.eup %2033 }
 0x195   : > { %v367_v26 = vmul.f32 %v2034_v24, %v351_v6 }
 0x197   : > { %v376_v28 = vmul.f32 %v1759_v25, %v367_v26 }
 0x198   : > { %v2036_v29 = vpop.eup %2035 }
 0x199   : > { %v368_v30 = vmul.f32 %v2036_v29, %v352_v10  ;;  %v385_v31 = vadd.f32 %v1760_v27, %v376_v28 }
 0x19b   : > { %v377_v32 = vmul.f32 %v1759_v25, %v368_v30  ;;  %1862 = vmatprep.mubr.msk.f32.mxu0 %vm341_vm0, %v385_v31  ;;  %v479_v31 = vld [vmem:[#allocation8] sm:$0xff] }
 0x19d   : > { %v386_v33 = vadd.f32 %v1760_v27, %v377_v32  ;;  %v480_v27 = vld [vmem:[#allocation8 + $0x8] sm:$0xff] }
 0x19f   : > { %1863 = vmatmul.mubr.msk.f32.vlgmr.msra.gmra.mxu0 %vm341_vm0, %v386_v33 }
 0x25f   : > { %v1864_v35 = vpop.f32.mrf.mxu0 }
 0x260   : > { %v2491_v36 = vadd.f32 %v1864_v35, %v1761_v34 }
 0x261   : > { %v470_v37 = vpop.f32.mrf.mxu0 }
 0x262   : > { %v2493_v38 = vadd.f32 %v1761_v34, %v470_v37  ;;  %489 = vrot.lane.b32.xlu0 %v2491_v36, %s2255_s17  ;;  %v2506_v40 = vmul.f32 0.35355338, %v2491_v36 }
 0x264   : > { %487 = vrot.lane.b32.xlu1 %v2493_v38, %s2255_s17  ;;  %v2498_v39 = vmul.f32 0.35355338, %v2493_v38  ;;  %s1803_s17 = sshll.u32 %s2330_s28, 8  ;;  %s1629_s28 = scalar_lea.sflag [#allocation4], %s2453_s19 }
 0x266   : > { %687 = vrot.lane.b32.xlu0 %v2498_v39, %s2256_s10  ;;  %1869 = vmatprep.mubr.msk.f32.mxu1 %vm491_vm1, %v2498_v39 }
 0x268   : > { %693 = vrot.lane.b32.xlu1 %v2491_v36, %s2257_s13 }
 0x26c   : > { %691 = vrot.lane.b32.xlu1 %v2493_v38, %s2257_s13 }
 0x270   : > { %689 = vrot.lane.b32.xlu1 %v2506_v40, %s2256_s10  ;;  %s338_s10 = scalar_lea.vmem [#allocation10], %s1754_s3 }
 0x271   : > { %s1642_s13 = sshll.u32 %s338_s10, 4  ;;  %s2599_s13 = int_to_ptr.vmem [resolvable:$true] %s1642_s13 }
 0x272   : > { %s2175_s3 = scalar_lea.vmem %s2599_s13, 256 }
 0x273   : > { %p2176_p1 = scmp.ne.s32.totalorder %s2599_s13, %s2175_s3 }
 0x275   : > { %p2177_p4 = pnand %p2176_p1, %p2676_p2 }
 0x277   : > { %p2178_p6 = pneg %p2177_p4 }
 0x2d4   : > { %v490_v41 = vpop.permute.xlu0 %489 }
 0x2d5   : > { %1865 = vmatprep.subr.msk.mxu1 %vm491_vm1, %v490_v41 }
 0x2d6   : > { %1866 = vmatpush3.xpose.msk.msra.mxu1 %vm491_vm1, %v490_v41  ;;  %v488_v42 = vpop.permute.xlu1 %487 }
 0x2d7   : > { %1867 = vmatprep.subr.msk.mxu1 %vm491_vm1, %v488_v42 }
 0x2d8   : > { %v688_v44 = vpop.permute.xlu0 %687 }
 0x2da   : > { %1868 = vmatpush3.xpose.msk.msra.mxu1 %vm491_vm1, %v488_v42  ;;  %v694_v43 = vpop.permute.xlu1 %693 }
 0x2db   : > { %1879 = vmatprep.subr.msk.mxu1 %vm491_vm1, %v694_v43 }
 0x2dd   : > { %1870 = vmatmul.mubr.msk.f32.vlgmr.msra.gmra.mxu1 %vm491_vm1, %v2506_v40 }
 0x2de   : > { %v692_v45 = vpop.permute.xlu1 %691  ;;  %1880 = vmatpush3.xpose.msk.msra.mxu1 %vm491_vm1, %v694_v43  ;;  %1883 = vmatprep.mubr.msk.f32.mxu1 %vm491_vm1, %v688_v44 }
 0x2df   : > { %1881 = vmatprep.subr.msk.mxu1 %vm491_vm1, %v692_v45 }
 0x2e2   : > { %1882 = vmatpush3.xpose.msk.msra.mxu1 %vm491_vm1, %v692_v45  ;;  %v690_v46 = vpop.permute.xlu1 %689 }
 0x2e3   : > { %1898 = vmatprep.subr.mxu1 %v479_v31 }
 0x2e5   : > { %1884 = vmatmul.mubr.msk.f32.vlgmr.msra.gmra.mxu1 %vm491_vm1, %v690_v46 }
 0x2e6   : > { %1899 = vmatpush3.msra.mxu1 %v479_v31 }
 0x39d   : > { %v1871_v47 = vpop.f32.mrf.mxu1 }
 0x39e   : > { %v581_v48 = vsel %vm577_vm2, %v1871_v47, -inf }
 0x39f   : > { %582 = vmax.xlane.f32.xlu1 %v581_v48  ;;  %v568_v49 = vpop.f32.mrf.mxu1 }
 0x3a0   : > { %v578_v50 = vsel %vm577_vm2, %v568_v49, -inf }
 0x3a1   : > { %579 = vmax.xlane.f32.xlu0 %v578_v50 }
 0x3a5   : > { %v1885_v51 = vpop.f32.mrf.mxu1 }
 0x3a6   : > { %v781_v54 = vsel %vm577_vm2, %v1885_v51, -inf }
 0x3a7   : > { %v769_v52 = vpop.f32.mrf.mxu1 }
 0x3a8   : > { %v778_v53 = vsel %vm577_vm2, %v769_v52, -inf }
 0x3a9   : > { %779 = vmax.xlane.f32.xlu0 %v778_v53 }
 0x3ad   : > { %782 = vmax.xlane.f32.xlu0 %v781_v54 }
 0x428   : > { %v583_v55 = vpop.xlane.xlu1 %582 }
 0x429   : > { %v585_v56 = vsub.f32 %v1871_v47, %v583_v55 }
 0x42a   : > { %v580_v57 = vpop.xlane.xlu0 %579 }
 0x42b   : > { %v588_v58 = vmul.f32 1.442695, %v585_v56  ;;  %v584_v59 = vsub.f32 %v568_v49, %v580_v57 }
 0x42d   : > { %2037 = vpow2.f32 %v588_v58  ;;  %v586_v60 = vmul.f32 1.442695, %v584_v59 }
 0x42f   : > { %2039 = vpow2.f32 %v586_v60 }
 0x432   : > { %v780_v61 = vpop.xlane.xlu0 %779 }
 0x433   : > { %v784_v62 = vsub.f32 %v769_v52, %v780_v61 }
 0x435   : > { %v786_v63 = vmul.f32 1.442695, %v784_v62 }
 0x436   : > { %v783_v2 = vpop.xlane.xlu0 %782 }
 0x437   : > { %2041 = vpow2.f32 %v786_v63  ;;  %v785_v3 = vsub.f32 %v1885_v51, %v783_v2 }
 0x439   : > { %v788_v4 = vmul.f32 1.442695, %v785_v3 }
 0x43a   : > { %v2038_v5 = vpop.eup %2037 }
 0x43b   : > { %2043 = vpow2.f32 %v788_v4  ;;  %v593_v6 = vsel %vm577_vm2, %v2038_v5, 0.0 }
 0x43c   : > { %v2040_v7 = vpop.eup %2039  ;;  %594 = vadd.xlane.f32.xlu1 %v593_v6 }
 0x43d   : > { %v590_v8 = vsel %vm577_vm2, %v2040_v7, 0.0 }
 0x43e   : > { %591 = vadd.xlane.f32.xlu0 %v590_v8 }
 0x444   : > { %v2042_v9 = vpop.eup %2041 }
 0x445   : > { %v790_v10 = vsel %vm577_vm2, %v2042_v9, 0.0 }
 0x446   : > { %791 = vadd.xlane.f32.xlu0 %v790_v10 }
 0x448   : > { %v2044_v11 = vpop.eup %2043 }
 0x449   : > { %v793_v12 = vsel %vm577_vm2, %v2044_v11, 0.0 }
 0x44a   : > { %794 = vadd.xlane.f32.xlu1 %v793_v12 }
 0x45b   : > { %600 = vrot.lane.b32.xlu1 %v2493_v38, %s2258_s22 }
 0x45c   : > { %602 = vrot.lane.b32.xlu0 %v2491_v36, %s2258_s22 }
 0x45f   : > { %802 = vrot.lane.b32.xlu1 %v2491_v36, %s2259_s23 }
 0x460   : > { %1055 = vrot.lane.b32.xlu0 %v2491_v36, %s2260_s18 }
 0x463   : > { %800 = vrot.lane.b32.xlu1 %v2493_v38, %s2259_s23 }
 0x464   : > { %1049 = vrot.lane.b32.xlu0 %v2498_v39, %s2261_s29 }
 0x467   : > { %1053 = vrot.lane.b32.xlu1 %v2493_v38, %s2260_s18  ;;  %s2597_s18 = scalar_lea.hbm %s2652_s7, %s1803_s17 }
 0x468   : > { %1338 = vrot.lane.b32.xlu0 %v2491_v36, %s2262_s16 }
 0x46b   : > { %1051 = vrot.lane.b32.xlu1 %v2506_v40, %s2261_s29  ;;  %s2266_s29 = smov [#allocation10]  }
 0x46c   : > { %1332 = vrot.lane.b32.xlu0 %v2498_v39, %s2263_s12 }
 0x46f   : > { %1336 = vrot.lane.b32.xlu1 %v2493_v38, %s2262_s16  ;;  %s2179_s16 = sshll.u32 %s2266_s29, 4  ;;  %s2180_s16 = int_to_ptr.vmem [resolvable:$false] %s2179_s16 }
 0x470   : > { %p2182_p12 = scmp.lt.s32.totalorder %s2599_s13, %s2180_s16 }
 0x473   : > { %1334 = vrot.lane.b32.xlu1 %v2506_v40, %s2263_s12  ;;  %s2181_s12 = scalar_lea.vmem %s2180_s16, 512 }
 0x474   : > { %p2183_p5 = scmp.lt.s32.totalorder %s2181_s12, %s2175_s3 }
 0x476   : > { %p2184_p7 = por %p2183_p5, %p2182_p12 }
 0x478   : > { %p2185_p13 = pnand %p2184_p7, %p2178_p6 }
 0x4c5   : > { %v595_v13 = vpop.xlane.xlu1 %594 }
 0x4c6   : > { %2045 = vrcp.f32 %v595_v13 }
 0x4c7   : > { %v592_v14 = vpop.xlane.xlu0 %591 }
 0x4c8   : > { %2047 = vrcp.f32 %v592_v14  ;;  %v481_v14 = vld [vmem:[#allocation8 + $0x10] sm:$0xff] }
 0x4cf   : > { %v792_v15 = vpop.xlane.xlu0 %791 }
 0x4d0   : > { %2049 = vrcp.f32 %v792_v15 }
 0x4d3   : > { %v795_v16 = vpop.xlane.xlu1 %794  ;;  %v603_v17 = vpop.permute.xlu0 %602 }
 0x4d4   : > { %v2046_v18 = vpop.eup %2045  ;;  %2051 = vrcp.f32 %v795_v16  ;;  %1872 = vmatprep.subr.mxu0 %v603_v17 }
 0x4d5   : > { %v2048_v19 = vpop.eup %2047  ;;  %1873 = vmatpush3.msra.mxu0 %v603_v17  ;;  %v599_v22 = vmul.f32 %v2046_v18, %v2038_v5 }
 0x4d6   : > { %v597_v20 = vmul.f32 %v2048_v19, %v2040_v7 }
 0x4d7   : > { %v601_v21 = vpop.permute.xlu1 %600  ;;  %v1056_v30 = vpop.permute.xlu0 %1055 }
 0x4d8   : > { %1874 = vmatprep.subr.mxu0 %v601_v21  ;;  %1876 = vmatprep.mubr.msk.f32.mxu0 %vm577_vm2, %v597_v20 }
 0x4d9   : > { %1875 = vmatpush3.msra.mxu0 %v601_v21 }
 0x4da   : > { %1877 = vmatmul.mubr.msk.f32.vlgmr.msra.gmra.mxu0 %vm577_vm2, %v599_v22 }
 0x4db   : > { %v803_v23 = vpop.permute.xlu1 %802  ;;  %v1050_v34 = vpop.permute.xlu0 %1049 }
 0x4dc   : > { %1886 = vmatprep.subr.mxu0 %v803_v23 }
 0x4dd   : > { %v2050_v24 = vpop.eup %2049  ;;  %1887 = vmatpush3.msra.mxu0 %v803_v23 }
 0x4de   : > { %v797_v25 = vmul.f32 %v2050_v24, %v2042_v9 }
 0x4df   : > { %v801_v26 = vpop.permute.xlu1 %800  ;;  %v1339_v40 = vpop.permute.xlu0 %1338 }
 0x4e0   : > { %1888 = vmatprep.subr.mxu0 %v801_v26  ;;  %1890 = vmatprep.mubr.msk.f32.mxu0 %vm577_vm2, %v797_v25 }
 0x4e1   : > { %v2052_v28 = vpop.eup %2051  ;;  %1889 = vmatpush3.msra.mxu0 %v801_v26 }
 0x4e2   : > { %1893 = vmatprep.subr.mxu0 %v480_v27  ;;  %v799_v29 = vmul.f32 %v2052_v28, %v2044_v11 }
 0x4e3   : > { %v1054_v37 = vpop.permute.xlu1 %1053  ;;  %v1333_v42 = vpop.permute.xlu0 %1332 }
 0x4e4   : > { %1891 = vmatmul.mubr.msk.f32.vlgmr.msra.gmra.mxu0 %vm577_vm2, %v799_v29 }
 0x4e5   : > { %1894 = vmatpush3.msra.mxu0 %v480_v27 }
 0x4e6   : > { %1903 = vmatprep.subr.msk.mxu0 %vm491_vm1, %v1056_v30 }
 0x4e7   : > { %v1052_v41 = vpop.permute.xlu1 %1051 }
 0x4eb   : > { %v1337_v43 = vpop.permute.xlu1 %1336 }
 0x4ef   : > { %v1335_v44 = vpop.permute.xlu1 %1334 }
 0x59a   : > { %v1878_v32 = vpop.f32.mrf.mxu0 }
 0x59c   : > { %v678_v33 = vpop.f32.mrf.mxu0 }
 0x59d   : > { %1900 = vmatprep.mubr.msk.f32.mxu1 %vm491_vm1, %v678_v33  ;;  %v482_v33 = vld [vmem:[#allocation8 + $0x18] sm:$0xff] }
 0x59e   : > { %1901 = vmatmul.mubr.msk.f32.vlgmr.msra.gmra.mxu1 %vm491_vm1, %v1878_v32 }
 0x5a4   : > { %v1892_v35 = vpop.f32.mrf.mxu0 }
 0x5a6   : > { %v878_v39 = vpop.f32.mrf.mxu0 }
 0x5a7   : > { %1895 = vmatprep.mubr.msk.f32.mxu0 %vm491_vm1, %v878_v39 }
 0x5a8   : > { %1896 = vmatmul.mubr.msk.f32.vlgmr.msra.gmra.mxu0 %vm491_vm1, %v1892_v35 }
 0x5a9   : > { %1904 = vmatpush3.xpose.msk.msra.mxu0 %vm491_vm1, %v1056_v30  ;;  %1907 = vmatprep.mubr.msk.f32.mxu0 %vm491_vm1, %v1050_v34 }
 0x5aa   : > { %1905 = vmatprep.subr.msk.mxu0 %vm491_vm1, %v1054_v37 }
 0x5ad   : > { %1906 = vmatpush3.xpose.msk.msra.mxu0 %vm491_vm1, %v1054_v37 }
 0x5ae   : > { %1922 = vmatprep.subr.msk.mxu0 %vm491_vm1, %v1339_v40 }
 0x5b0   : > { %1908 = vmatmul.mubr.msk.f32.vlgmr.msra.gmra.mxu0 %vm491_vm1, %v1052_v41 }
 0x5b1   : > { %1923 = vmatpush3.xpose.msk.msra.mxu0 %vm491_vm1, %v1339_v40  ;;  %1926 = vmatprep.mubr.msk.f32.mxu0 %vm491_vm1, %v1333_v42 }
 0x5b2   : > { %1924 = vmatprep.subr.msk.mxu0 %vm491_vm1, %v1337_v43 }
 0x5b5   : > { %1925 = vmatpush3.xpose.msk.msra.mxu0 %vm491_vm1, %v1337_v43 }
 0x5b8   : > { %1927 = vmatmul.mubr.msk.f32.vlgmr.msra.gmra.mxu0 %vm491_vm1, %v1335_v44  ;;  %v1796_v44 = vld [vmem:[%s2651_s6] ss:$0 sm:$0xff] }
 0x65e   : > { %v1902_v45 = vpop.f32.mrf.mxu1 }
 0x660   : > { %v1040_v25 = vpop.f32.mrf.mxu1 }
 0x668   : > { %v1897_v46 = vpop.f32.mrf.mxu0 }
 0x669   : > { %v2561_v47 = vadd.f32 %v1902_v45, %v1897_v46 }
 0x66a   : > { %v2563_v48 = vpop.f32.mrf.mxu0 }
 0x66b   : > { %v1041_v35 = vadd.f32 %v1040_v25, %v2563_v48 }
 0x670   : > { %v1909_v49 = vpop.f32.mrf.mxu0 }
 0x671   : > { %v1143_v50 = vsel %vm577_vm2, %v1909_v49, -inf }
 0x672   : > { %1144 = vmax.xlane.f32.xlu1 %v1143_v50  ;;  %v1131_v51 = vpop.f32.mrf.mxu0 }
 0x673   : > { %v1140_v52 = vsel %vm577_vm2, %v1131_v51, -inf }
 0x674   : > { %1141 = vmax.xlane.f32.xlu0 %v1140_v52 }
 0x678   : > { %v1928_v53 = vpop.f32.mrf.mxu0 }
 0x679   : > { %v1426_v8 = vsel %vm577_vm2, %v1928_v53, -inf }
 0x67a   : > { %v1414_v54 = vpop.f32.mrf.mxu0 }
 0x67b   : > { %v1423_v55 = vsel %vm577_vm2, %v1414_v54, -inf }
 0x683   : > { %1162 = vrot.lane.b32.xlu1 %v2493_v38, %s2264_s30 }
 0x6a7   : > { %1424 = vmax.xlane.f32.xlu1 %v1423_v55 }
 0x6fb   : > { %v1145_v56 = vpop.xlane.xlu1 %1144 }
 0x6fc   : > { %v1147_v57 = vsub.f32 %v1909_v49, %v1145_v56 }
 0x6fd   : > { %v1142_v58 = vpop.xlane.xlu0 %1141 }
 0x6fe   : > { %v1150_v59 = vmul.f32 1.442695, %v1147_v57  ;;  %v1146_v60 = vsub.f32 %v1131_v51, %v1142_v58 }
 0x6ff   : > { %v1163_v4 = vpop.permute.xlu1 %1162 }
 0x700   : > { %2053 = vpow2.f32 %v1150_v59  ;;  %v1148_v61 = vmul.f32 1.442695, %v1146_v60 }
 0x702   : > { %2055 = vpow2.f32 %v1148_v61 }
 0x70d   : > { %v2054_v62 = vpop.eup %2053 }
 0x70e   : > { %v1155_v63 = vsel %vm577_vm2, %v2054_v62, 0.0 }
 0x70f   : > { %v2056_v2 = vpop.eup %2055  ;;  %1156 = vadd.xlane.f32.xlu0 %v1155_v63 }
 0x710   : > { %v1152_v3 = vsel %vm577_vm2, %v2056_v2, 0.0 }
 0x713   : > { %1153 = vadd.xlane.f32.xlu0 %v1152_v3 }
 0x729   : > { %1164 = vrot.lane.b32.xlu0 %v2491_v36, %s2264_s30 }
 0x730   : > { %v1425_v5 = vpop.xlane.xlu1 %1424 }
 0x731   : > { %v1429_v6 = vsub.f32 %v1414_v54, %v1425_v5 }
 0x733   : > { %v1431_v7 = vmul.f32 1.442695, %v1429_v6 }
 0x735   : > { %2057 = vpow2.f32 %v1431_v7 }
 0x742   : > { %v2058_v9 = vpop.eup %2057 }
 0x743   : > { %v1435_v10 = vsel %vm577_vm2, %v2058_v9, 0.0 }
 0x748   : > { %1427 = vmax.xlane.f32.xlu0 %v1426_v8 }
 0x74c   : > { %1436 = vadd.xlane.f32.xlu0 %v1435_v10 }
 0x762   : > { %1447 = vrot.lane.b32.xlu0 %v2491_v36, %s2265_s9 }
 0x798   : > { %v1157_v11 = vpop.xlane.xlu0 %1156 }
 0x799   : > { %2059 = vrcp.f32 %v1157_v11 }
 0x79c   : > { %v1154_v12 = vpop.xlane.xlu0 %1153 }
 0x79d   : > { %2061 = vrcp.f32 %v1154_v12 }
 0x7a0   : > { %v1165_v13 = vpop.permute.xlu0 %1164 }
 0x7a1   : > { %1910 = vmatprep.subr.mxu1 %v1165_v13 }
 0x7a2   : > { %1911 = vmatpush3.msra.mxu1 %v1165_v13 }
 0x7a3   : > { %1912 = vmatprep.subr.mxu1 %v1163_v4 }
 0x7a4   : > { %1913 = vmatpush3.msra.mxu1 %v1163_v4 }
 0x7a5   : > { %1917 = vmatprep.subr.mxu1 %v481_v14 }
 0x7a6   : > { %v2060_v15 = vpop.eup %2059 }
 0x7a7   : > { %v1161_v18 = vmul.f32 %v2060_v15, %v2054_v62 }
 0x7aa   : > { %v2062_v16 = vpop.eup %2061 }
 0x7ab   : > { %v1159_v17 = vmul.f32 %v2062_v16, %v2056_v2 }
 0x7ad   : > { %1914 = vmatprep.mubr.msk.f32.mxu1 %vm577_vm2, %v1159_v17 }
 0x7ae   : > { %1915 = vmatmul.mubr.msk.f32.vlgmr.msra.gmra.mxu1 %vm577_vm2, %v1161_v18 }
 0x7af   : > { %1918 = vmatpush3.msra.mxu1 %v481_v14 }
 0x7d1   : > { %v1428_v36 = vpop.xlane.xlu0 %1427 }
 0x7d2   : > { %v1430_v19 = vsub.f32 %v1928_v53, %v1428_v36 }
 0x7d4   : > { %v1433_v20 = vmul.f32 1.442695, %v1430_v19 }
 0x7d5   : > { %v1437_v21 = vpop.xlane.xlu0 %1436 }
 0x7d6   : > { %2063 = vpow2.f32 %v1433_v20 }
 0x7d7   : > { %2065 = vrcp.f32 %v1437_v21 }
 0x7d9   : > { %v1448_v22 = vpop.permute.xlu0 %1447 }
 0x7da   : > { %1929 = vmatprep.subr.mxu1 %v1448_v22 }
 0x7e3   : > { %v2064_v23 = vpop.eup %2063 }
 0x7e4   : > { %v1438_v24 = vsel %vm577_vm2, %v2064_v23, 0.0  ;;  %v2066_v26 = vpop.eup %2065 }
 0x7e5   : > { %1439 = vadd.xlane.f32.xlu1 %v1438_v24  ;;  %v1442_v30 = vmul.f32 %v2066_v26, %v2058_v9 }
 0x7f6   : > { %1445 = vrot.lane.b32.xlu1 %v2493_v38, %s2265_s9 }
 0x86e   : > { %v1916_v27 = vpop.f32.mrf.mxu1  ;;  %v1440_v28 = vpop.xlane.xlu1 %1439 }
 0x86f   : > { %2067 = vrcp.f32 %v1440_v28 }
 0x870   : > { %v1240_v29 = vpop.f32.mrf.mxu1 }
 0x871   : > { %1919 = vmatprep.mubr.msk.f32.mxu1 %vm491_vm1, %v1240_v29 }
 0x872   : > { %1920 = vmatmul.mubr.msk.f32.vlgmr.msra.gmra.mxu1 %vm491_vm1, %v1916_v27  ;;  %v1446_v31 = vpop.permute.xlu1 %1445 }
 0x873   : > { %1930 = vmatpush3.msra.mxu1 %v1448_v22  ;;  %1933 = vmatprep.mubr.msk.f32.mxu1 %vm577_vm2, %v1442_v30 }
 0x874   : > { %1931 = vmatprep.subr.mxu1 %v1446_v31 }
 0x875   : > { %1932 = vmatpush3.msra.mxu1 %v1446_v31 }
 0x876   : > { %1936 = vmatprep.subr.mxu1 %v482_v33 }
 0x87c   : > { %v2068_v32 = vpop.eup %2067 }
 0x87d   : > { %v1444_v38 = vmul.f32 %v2068_v32, %v2064_v23 }
 0x87f   : > { %1934 = vmatmul.mubr.msk.f32.vlgmr.msra.gmra.mxu1 %vm577_vm2, %v1444_v38 }
 0x880   : > { %1937 = vmatpush3.msra.mxu1 %v482_v33 }
 0x932   : > { %v1921_v34 = vpop.f32.mrf.mxu1 }
 0x933   : > { %v1331_v37 = vadd.f32 %v1921_v34, %v2561_v47 }
 0x934   : > { %v1321_v39 = vpop.f32.mrf.mxu1 }
 0x935   : > { %v1330_v40 = vadd.f32 %v1321_v39, %v1041_v35 }
 0x93f   : > { %v1935_v41 = vpop.f32.mrf.mxu1 }
 0x941   : > { %v1523_v42 = vpop.f32.mrf.mxu1 }
 0x942   : > { %1938 = vmatprep.mubr.msk.f32.mxu1 %vm491_vm1, %v1523_v42 }
 0x943   : > { %1939 = vmatmul.mubr.msk.f32.vlgmr.msra.gmra.mxu1 %vm491_vm1, %v1935_v41 }
 0xa03   : > { %v1940_v43 = vpop.f32.mrf.mxu1 }
 0xa04   : > { %v1614_v45 = vadd.f32 %v1940_v43, %v1331_v37 }
 0xa05   : > { %v1604_v46 = vpop.f32.mrf.mxu1 }
 0xa06   : > { %v1623_v48 = vadd.f32 %v1796_v44, %v1614_v45  ;;  %v1613_v49 = vadd.f32 %v1604_v46, %v1330_v40 }
 0xa08   : > { %v1625_v47 = vadd.f32 %v1623_v48, %v2473_v1  ;;  %v1622_v50 = vadd.f32 %v1796_v44, %v1613_v49 }
 0xa0a   : > { %1627 = vst.msk [vmem:[%s338_s10 + $0x8] sm:$0xff] %vm341_vm0, %v1625_v47  ;;  %v1624_v51 = vadd.f32 %v1622_v50, %v2471_v0 }
 0xa0c   : > { %1626 = vst.msk [vmem:[%s338_s10] sm:$0xff] %vm341_vm0, %v1624_v51 }
 0xa0d   : > { %2188 = shalt.err (!%p2185_p13)
}
 0xa0e   : > { %s2189_s30 = scalar_lea.hbm %s2597_s18, 256  ;;  %s2193_s15 = scalar_lea.hbm %s2652_s7, 512 }
 0xa0f   : > { %p2190_p9 = scmp.ne.s32.totalorder %s2597_s18, %s2189_s30  ;;  %p2194_p11 = scmp.lt.s32.totalorder %s2597_s18, %s2652_s7 }
 0xa10   : > { %p2195_p0 = scmp.lt.s32.totalorder %s2193_s15, %s2189_s30 }
 0xa11   : > { %p2191_p8 = pnand %p2190_p9, %p2676_p2 }
 0xa12   : > { %p2196_p10 = por %p2195_p0, %p2194_p11 }
 0xa13   : > { %p2192_p3 = pneg %p2191_p8 }
 0xa15   : > { %p2197_p1 = pnand %p2196_p10, %p2192_p3 }
 0xa17   : > { %2200 = shalt.err (!%p2197_p1)
}
 0xa18   : > { %s2267_s22 = smov 128   ;;  %s2268_s23 = smov 8  }
 0xa19   : > { %1955 = dma.vmem_to_hbm [thread:$0]  (%p2676_p2), %s2599_s13, 256, %s2597_s18, %s1629_s28, %s2267_s22, %s2267_s22, %s2268_s23  }
 0xa1a PF: > { %s1657_s3 = sand.u32 1, %s2235_s24   ;;  %p2677_p4 = scmp.ne.s32.totalorder %s2661_s8, 0 }
 0xa1b   : > { %p2678_p6 = scmp.ge.s32.totalorder %s2247_s27, 2  ;;  %s1658_s29 = scalar_lea.sflag [#allocation4], %s1657_s3 }
 0xa1d   : > { %p1972_p12 = pnand %p2678_p6, %p2677_p4 }
 0xa1f   : > { %p1973_p5 = pneg %p1972_p12 }
 0xa21   : > { %2230 = dma.done.wait (%p1973_p5), %s1658_s29, 256  }
 0xa22   : > { %2232 = vsyncadd (%p1973_p5), %s1658_s29, 4294967040  ;;  %p22_p7 = scmp.ge.s32.totalorder %s2395_s14, 4   ;;  %s2679_s24 = smov %s2239_s25 }
 0xa23   : > { %s2680_s25 = smov %s2243_s26  ;;  %s2681_s26 = smov %s2405_s20 }
 0xa24   : > { %s2682_s27 = smov %s2395_s14  ;;  %24 = sbr.rel (!%p22_p7) target bundleno = 9 (0x9), region = 105 }
 0xa29   :  { %1663 = vsyncpa [#allocation3], 1 }
 0xa2a   :  { %1665 = vsyncpa [#allocation3 + $0x1], 1 }
 0xa2b   :  { %1666 = vsyncpa [#allocation6], 1 }
 0xa2c   :  { %1667 = vsyncpa [#allocation9], 1 }
 0xa2d   :  { %1668 = vsyncpa [#allocation4], 1 }
 0xa2e   :  { %1670 = vsyncpa [#allocation4 + $0x1], 1 }

</bundles_post_ra>
